<compile_context>
chip_gen: v7x
topology: tpu7x:2x2x1
jax: 0.10.0
libtpu: 0.0.40
codegen_flags: <defaults>
</compile_context>

<pallas_src>
import jax
import jax.numpy as jnp
from jax import lax
from jax.experimental import pallas as pl
from jax.experimental.pallas import tpu as pltpu

R = 20  # matches range_list = [20] * 8 inside RD_loss4.forward


def _make_kernel(Bt, H, W, Hp, Wp, compute_dtype):
    """Kernel over a (Bt, Hp, Wp) block; H, W are the *logical* image dims."""
    # Compile-time per-direction weights.  Each direction appears twice in the
    # PyTorch loss (top==bottom, right==left, lt==br, rt==bl under abs), hence
    # the factor 2.  The 1/B average is applied on the host.
    w_v = 2.0 / float((H - R) * W)        # top + bottom
    w_h = 2.0 / float(H * (W - R))        # right + left
    w_d = 2.0 / float((H - R) * (W - R))  # both diagonal pairs
    inv_n = 1.0 / float(H * W)
    cdt = compute_dtype

    def per_image(p_f32, g_f32, wv, wh, mv, wd):
        # Scalar normalizations in f32 (no zero guard, matching PyTorch).
        inv_mean_p = 1.0 / (jnp.sum(p_f32) * inv_n)            # applied once
        neg_scale_g = (-(1.0 / (jnp.sum(g_f32) * inv_n))).astype(cdt)

        p = p_f32.astype(cdt)
        g = g_f32.astype(cdt)

        # Rolls on aligned padded tiles: result[i] = x[(i + R) % N].  In the
        # masked-valid region i < dim - R this is exactly x[i + R].
        p_v = pltpu.roll(p, Hp - R, axis=0)      # x[i+R, j  ]
        p_h = pltpu.roll(p, Wp - R, axis=1)      # x[i  , j+R]
        p_vh = pltpu.roll(p_v, Wp - R, axis=1)   # x[i+R, j+R]
        g_v = pltpu.roll(g, Hp - R, axis=0)
        g_h = pltpu.roll(g, Wp - R, axis=1)
        g_vh = pltpu.roll(g_v, Wp - R, axis=1)

        # |diffs| on RAW pred (pred normalization factored out as a scalar).
        dp_v = jnp.abs(p_v - p)     # vertical   (top/bottom)
        dp_h = jnp.abs(p_h - p)     # horizontal (right/left)
        dp_d1 = jnp.abs(p_vh - p)   # main diagonal
        dp_d2 = jnp.abs(p_v - p_h)  # anti diagonal

        # exp(-|dg| / mean_g): gt normalization is a scalar multiply.
        e_v = jnp.exp(jnp.abs(g_v - g) * neg_scale_g)
        e_h = jnp.exp(jnp.abs(g_h - g) * neg_scale_g)
        e_d1 = jnp.exp(jnp.abs(g_vh - g) * neg_scale_g)
        e_d2 = jnp.exp(jnp.abs(g_v - g_h) * neg_scale_g)

        # One weighted accumulation map (masks are stride-0 broadcasts),
        # one f32 reduction per image.
        acc = (dp_v * e_v) * wv \
            + (dp_h * e_h) * wh \
            + ((dp_d1 * e_d1 + dp_d2 * e_d2) * mv) * wd
        return jnp.sum(acc.astype(jnp.float32)) * inv_mean_p

    def kernel(p_ref, g_ref, o_ref):
        # Broadcastable 1-D validity/weight masks (no full (H,W) mask maps).
        row = lax.broadcasted_iota(jnp.int32, (Hp, 1), 0)
        col = lax.broadcasted_iota(jnp.int32, (1, Wp), 1)
        valid_r = row < (H - R)
        valid_c = col < (W - R)
        wv = jnp.where(valid_r, w_v, 0.0).astype(cdt)   # (Hp, 1)
        wh = jnp.where(valid_c, w_h, 0.0).astype(cdt)   # (1, Wp)
        mv = jnp.where(valid_r, 1.0, 0.0).astype(cdt)   # (Hp, 1)
        wd = jnp.where(valid_c, w_d, 0.0).astype(cdt)   # (1, Wp)

        if Bt == 1:
            total = per_image(p_ref[0], g_ref[0], wv, wh, mv, wd)
        else:
            # Bounded live ranges: one image in flight at a time.
            def body(i, tot):
                return tot + per_image(p_ref[i], g_ref[i], wv, wh, mv, wd)
            total = lax.fori_loop(0, Bt, body, jnp.float32(0.0))

        # Lane-dense per-step output block (this grid step owns row `b`).
        o_ref[...] = jnp.full((1, 8, 128), total, dtype=jnp.float32)

    return kernel


def rd_loss4(pred, gt, *, compute_dtype=jnp.float32, max_block_images=8):
    """pred, gt: (B, 1, H, W) arrays (NCHW, like the PyTorch module).

    compute_dtype: element-wise pipeline dtype.  jnp.bfloat16 is a valid
    choice on v6e/v7x (reductions / normalizations stay f32); keep f32 on v5e.
    """
    B, C, H, W = pred.shape
    assert C == 1, "RD_loss4 expects single-channel depth maps"
    assert H > R and W > R, "spatial dims must exceed the shift range (20)"

    p = pred.reshape(B, H, W).astype(jnp.float32)
    g = gt.reshape(B, H, W).astype(jnp.float32)

    # Zero-pad spatial dims to (8, 128)-aligned tiles so rolls stay aligned.
    # Padded elements contribute 0 to every directional term and every sum.
    Hp = ((H + 7) // 8) * 8
    Wp = ((W + 127) // 128) * 128
    if (Hp, Wp) != (H, W):
        p = jnp.pad(p, ((0, 0), (0, Hp - H), (0, Wp - W)))
        g = jnp.pad(g, ((0, 0), (0, Hp - H), (0, Wp - W)))

    # --- Bt / grid selection ------------------------------------------------
    # Real depth maps: one image per grid step (grid=(B,)).  Toy images may be
    # batched to amortize the ~0.35 us per-step overhead, but Bt is capped at
    # B//2 so the "parallel" grid keeps >= 2 steps (both v7x TCs active).
    img_bytes = Hp * Wp * 4
    LARGE_IMAGE_BYTES = 256 * 1024
    if img_bytes >= LARGE_IMAGE_BYTES or B == 1:
        Bt = 1
    else:
        budget_imgs = max(1, (2 * 1024 * 1024) // img_bytes)  # ~2 MiB / input
        cap = min(max_block_images, budget_imgs, max(1, B // 2))
        Bt = 1
        for d in range(1, B + 1):  # falls back to 1 for prime B (by design)
            if B % d == 0 and d <= cap:
                Bt = d
    G = B // Bt

    # --- VMEM budget from the real footprint ---------------------------------
    # 2 inputs x 2 pipeline buffers x block  +  ~20 live (Hp,Wp) f32 temps
    # (rolls / diffs / exps / acc)  +  double-buffered output  +  margin.
    block_bytes = Bt * img_bytes
    needed = 2 * 2 * block_bytes + 20 * img_bytes + 2 * (8 * 128 * 4) + (1 << 20)
    vmem_limit = int(min(max(needed, 16 * (1 << 20)), 64 * (1 << 20)))

    cost = pl.CostEstimate(
        flops=35 * B * Hp * Wp,
        transcendentals=4 * B * Hp * Wp,
        bytes_accessed=2 * B * Hp * Wp * 4 + G * 8 * 128 * 4,
    )

    kernel = _make_kernel(Bt, H, W, Hp, Wp, compute_dtype)
    sums = pl.pallas_call(
        kernel,
        out_shape=jax.ShapeDtypeStruct((G, 8, 128), jnp.float32),
        grid=(G,),
        in_specs=[
            pl.BlockSpec((Bt, Hp, Wp), lambda b: (b, 0, 0)),
            pl.BlockSpec((Bt, Hp, Wp), lambda b: (b, 0, 0)),
        ],
        out_specs=pl.BlockSpec((1, 8, 128), lambda b: (b, 0, 0)),
        compiler_params=pltpu.CompilerParams(
            dimension_semantics=("parallel",),
            vmem_limit_bytes=vmem_limit,
        ),
        cost_estimate=cost,
    )(p, g)

    # Per-direction 1/(h'*w') counts and per-image 1/mean_pred are already
    # folded in; only the 1/B batch average remains.
    return jnp.sum(sums[:, 0, 0]) / jnp.float32(B)


def _rd_loss4_ref(pred, gt):
    """Pure-JAX reference mirroring the PyTorch forward, for validation."""
    p = pred.astype(jnp.float32)
    g = gt.astype(jnp.float32)
    norm_p = p / p.mean(axis=(2, 3), keepdims=True)
    norm_g = g / g.mean(axis=(2, 3), keepdims=True)

    def rd_maps(x):
        return [
            jnp.abs(x[:, :, R:, :] - x[:, :, :-R, :]),      # top
            jnp.abs(x[:, :, :, :-R] - x[:, :, :, R:]),      # right
            jnp.abs(x[:, :, :-R, :] - x[:, :, R:, :]),      # bottom
            jnp.abs(x[:, :, :, R:] - x[:, :, :, :-R]),      # left
            jnp.abs(x[:, :, R:, R:] - x[:, :, :-R, :-R]),   # left_top
            jnp.abs(x[:, :, R:, :-R] - x[:, :, :-R, R:]),   # right_top
            jnp.abs(x[:, :, :-R, :-R] - x[:, :, R:, R:]),   # bottom_right
            jnp.abs(x[:, :, :-R, R:] - x[:, :, R:, :-R]),   # bottom_left
        ]

    p_rd = rd_maps(norm_p)
    g_rd = rd_maps(norm_g)
    loss = 0.0
    for pr, gr in zip(p_rd, g_rd):
        loss = loss + jnp.mean(pr * jnp.exp(-gr))
    return loss


if __name__ == "__main__":
    def run_case(B, H, W, key):
        k1, k2 = jax.random.split(key)
        # positive "depth maps" to keep the mean-normalization well behaved
        pred = jax.random.uniform(k1, (B, 1, H, W), jnp.float32, 0.1, 1.1)
        gt = jax.random.uniform(k2, (B, 1, H, W), jnp.float32, 0.1, 1.1)
        loss = jax.block_until_ready(rd_loss4(pred, gt))
        loss_ref = jax.block_until_ready(_rd_loss4_ref(pred, gt))
        assert jnp.isfinite(loss), ("non-finite loss", B, H, W)
        assert jnp.allclose(loss, loss_ref, rtol=1e-3, atol=1e-5), (
            B, H, W, loss, loss_ref)

    k0, k1, k2 = jax.random.split(jax.random.PRNGKey(0), 3)
    run_case(2, 64, 128, k0)   # aligned dims; Bt=1, G=2 (both v7x TCs busy)
    run_case(3, 50, 90, k1)    # non-(8,128)-aligned spatial dims, prime batch
    run_case(8, 24, 32, k2)    # toy images: Bt=4, G=2 (fori_loop batched path)
    print("KERNEL_OK")
</pallas_src>

<mosaic_0001>
module attributes {stable_mosaic.version = 11 : i64} {
  func.func @kernel(%arg0: i32, %arg1: memref<1x64x128xf32, #tpu.memory_space<vmem>>, %arg2: memref<1x64x128xf32, #tpu.memory_space<vmem>>, %arg3: memref<1x8x128xf32, #tpu.memory_space<vmem>>) attributes {dimension_semantics = [#tpu.dimension_semantics<parallel>], iteration_bounds = array<i64: 2>, scalar_prefetch = 0 : i64, scratch_operands = 0 : i64, tpu.core_type = #tpu.core_type<tc>, window_params = [{transform_indices = @transform_0, window_bounds = array<i64: 1, 64, 128>}, {transform_indices = @transform_1, window_bounds = array<i64: 1, 64, 128>}, {transform_indices = @transform_2, window_bounds = array<i64: 1, 8, 128>}]} {
    %0 = tpu.iota {dimensions = array<i32: 0>} : vector<64x1xi32>
    %1 = tpu.iota {dimensions = array<i32: 1>} : vector<1x128xi32>
    %c44_i32 = arith.constant 44 : i32
    %2 = vector.broadcast %c44_i32 : i32 to vector<64x1xi32>
    %3 = arith.cmpi slt, %0, %2 : vector<64x1xi32>
    %c108_i32 = arith.constant 108 : i32
    %4 = vector.broadcast %c108_i32 : i32 to vector<1x128xi32>
    %5 = arith.cmpi slt, %1, %4 : vector<1x128xi32>
    %cst = arith.constant 3.55113647E-4 : f32
    %cst_0 = arith.constant 0.000000e+00 : f32
    %6 = vector.broadcast %cst : f32 to vector<64x1xf32>
    %7 = vector.broadcast %cst_0 : f32 to vector<64x1xf32>
    %8 = arith.select %3, %6, %7 : vector<64x1xi1>, vector<64x1xf32>
    %cst_1 = arith.constant 2.89351854E-4 : f32
    %cst_2 = arith.constant 0.000000e+00 : f32
    %9 = vector.broadcast %cst_1 : f32 to vector<1x128xf32>
    %10 = vector.broadcast %cst_2 : f32 to vector<1x128xf32>
    %11 = arith.select %5, %9, %10 : vector<1x128xi1>, vector<1x128xf32>
    %cst_3 = arith.constant 1.000000e+00 : f32
    %cst_4 = arith.constant 0.000000e+00 : f32
    %12 = vector.broadcast %cst_3 : f32 to vector<64x1xf32>
    %13 = vector.broadcast %cst_4 : f32 to vector<64x1xf32>
    %14 = arith.select %3, %12, %13 : vector<64x1xi1>, vector<64x1xf32>
    %cst_5 = arith.constant 4.20875411E-4 : f32
    %cst_6 = arith.constant 0.000000e+00 : f32
    %15 = vector.broadcast %cst_5 : f32 to vector<1x128xf32>
    %16 = vector.broadcast %cst_6 : f32 to vector<1x128xf32>
    %17 = arith.select %5, %15, %16 : vector<1x128xi1>, vector<1x128xf32>
    %c0 = arith.constant 0 : index
    %c0_7 = arith.constant 0 : index
    %c0_8 = arith.constant 0 : index
    %18 = vector.load %arg1[%c0, %c0_7, %c0_8] : memref<1x64x128xf32, #tpu.memory_space<vmem>>, vector<1x64x128xf32>
    %19 = vector.shape_cast %18 : vector<1x64x128xf32> to vector<64x128xf32>
    %c0_9 = arith.constant 0 : index
    %c0_10 = arith.constant 0 : index
    %c0_11 = arith.constant 0 : index
    %20 = vector.load %arg2[%c0_9, %c0_10, %c0_11] : memref<1x64x128xf32, #tpu.memory_space<vmem>>, vector<1x64x128xf32>
    %21 = vector.shape_cast %20 : vector<1x64x128xf32> to vector<64x128xf32>
    %22 = vector.shape_cast %19 : vector<64x128xf32> to vector<1x64x128xf32>
    %cst_12 = arith.constant dense<0.000000e+00> : vector<1xf32>
    %23 = vector.multi_reduction <add>, %22, %cst_12 [1, 2] : vector<1x64x128xf32> to vector<1xf32>
    %24 = vector.shape_cast %23 : vector<1xf32> to vector<1x1x1xf32>
    %25 = vector.extract %24[0, 0, 0] : f32 from vector<1x1x1xf32>
    %cst_13 = arith.constant 1.22070313E-4 : f32
    %26 = arith.mulf %25, %cst_13 : f32
    %cst_14 = arith.constant 1.000000e+00 : f32
    %27 = arith.divf %cst_14, %26 : f32
    %28 = vector.shape_cast %21 : vector<64x128xf32> to vector<1x64x128xf32>
    %cst_15 = arith.constant dense<0.000000e+00> : vector<1xf32>
    %29 = vector.multi_reduction <add>, %28, %cst_15 [1, 2] : vector<1x64x128xf32> to vector<1xf32>
    %30 = vector.shape_cast %29 : vector<1xf32> to vector<1x1x1xf32>
    %31 = vector.extract %30[0, 0, 0] : f32 from vector<1x1x1xf32>
    %cst_16 = arith.constant 1.22070313E-4 : f32
    %32 = arith.mulf %31, %cst_16 : f32
    %cst_17 = arith.constant 1.000000e+00 : f32
    %33 = arith.divf %cst_17, %32 : f32
    %cst_18 = arith.constant 0.000000e+00 : f32
    %34 = arith.subf %cst_18, %33 : f32
    %c44_i32_19 = arith.constant 44 : i32
    %35 = tpu.dynamic_rotate %19 by %c44_i32_19 dim 0 : vector<64x128xf32>, i32 -> vector<64x128xf32>
    %c108_i32_20 = arith.constant 108 : i32
    %36 = tpu.dynamic_rotate %19 by %c108_i32_20 dim 1 : vector<64x128xf32>, i32 -> vector<64x128xf32>
    %c108_i32_21 = arith.constant 108 : i32
    %37 = tpu.dynamic_rotate %35 by %c108_i32_21 dim 1 : vector<64x128xf32>, i32 -> vector<64x128xf32>
    %c44_i32_22 = arith.constant 44 : i32
    %38 = tpu.dynamic_rotate %21 by %c44_i32_22 dim 0 : vector<64x128xf32>, i32 -> vector<64x128xf32>
    %c108_i32_23 = arith.constant 108 : i32
    %39 = tpu.dynamic_rotate %21 by %c108_i32_23 dim 1 : vector<64x128xf32>, i32 -> vector<64x128xf32>
    %c108_i32_24 = arith.constant 108 : i32
    %40 = tpu.dynamic_rotate %38 by %c108_i32_24 dim 1 : vector<64x128xf32>, i32 -> vector<64x128xf32>
    %41 = arith.subf %35, %19 : vector<64x128xf32>
    %42 = math.absf %41 : vector<64x128xf32>
    %43 = arith.subf %36, %19 : vector<64x128xf32>
    %44 = math.absf %43 : vector<64x128xf32>
    %45 = arith.subf %37, %19 : vector<64x128xf32>
    %46 = math.absf %45 : vector<64x128xf32>
    %47 = arith.subf %35, %36 : vector<64x128xf32>
    %48 = math.absf %47 : vector<64x128xf32>
    %49 = arith.subf %38, %21 : vector<64x128xf32>
    %50 = math.absf %49 : vector<64x128xf32>
    %51 = vector.broadcast %34 : f32 to vector<64x128xf32>
    %52 = arith.mulf %50, %51 : vector<64x128xf32>
    %53 = math.exp %52 : vector<64x128xf32>
    %54 = arith.subf %39, %21 : vector<64x128xf32>
    %55 = math.absf %54 : vector<64x128xf32>
    %56 = vector.broadcast %34 : f32 to vector<64x128xf32>
    %57 = arith.mulf %55, %56 : vector<64x128xf32>
    %58 = math.exp %57 : vector<64x128xf32>
    %59 = arith.subf %40, %21 : vector<64x128xf32>
    %60 = math.absf %59 : vector<64x128xf32>
    %61 = vector.broadcast %34 : f32 to vector<64x128xf32>
    %62 = arith.mulf %60, %61 : vector<64x128xf32>
    %63 = math.exp %62 : vector<64x128xf32>
    %64 = arith.subf %38, %39 : vector<64x128xf32>
    %65 = math.absf %64 : vector<64x128xf32>
    %66 = vector.broadcast %34 : f32 to vector<64x128xf32>
    %67 = arith.mulf %65, %66 : vector<64x128xf32>
    %68 = math.exp %67 : vector<64x128xf32>
    %69 = arith.mulf %42, %53 : vector<64x128xf32>
    %70 = vector.broadcast %8 : vector<64x1xf32> to vector<64x128xf32>
    %71 = arith.mulf %69, %70 : vector<64x128xf32>
    %72 = arith.mulf %44, %58 : vector<64x128xf32>
    %73 = vector.broadcast %11 : vector<1x128xf32> to vector<64x128xf32>
    %74 = arith.mulf %72, %73 : vector<64x128xf32>
    %75 = arith.addf %71, %74 : vector<64x128xf32>
    %76 = arith.mulf %46, %63 : vector<64x128xf32>
    %77 = arith.mulf %48, %68 : vector<64x128xf32>
    %78 = arith.addf %76, %77 : vector<64x128xf32>
    %79 = vector.broadcast %14 : vector<64x1xf32> to vector<64x128xf32>
    %80 = arith.mulf %78, %79 : vector<64x128xf32>
    %81 = vector.broadcast %17 : vector<1x128xf32> to vector<64x128xf32>
    %82 = arith.mulf %80, %81 : vector<64x128xf32>
    %83 = arith.addf %75, %82 : vector<64x128xf32>
    %84 = vector.shape_cast %83 : vector<64x128xf32> to vector<1x64x128xf32>
    %cst_25 = arith.constant dense<0.000000e+00> : vector<1xf32>
    %85 = vector.multi_reduction <add>, %84, %cst_25 [1, 2] : vector<1x64x128xf32> to vector<1xf32>
    %86 = vector.shape_cast %85 : vector<1xf32> to vector<1x1x1xf32>
    %87 = vector.extract %86[0, 0, 0] : f32 from vector<1x1x1xf32>
    %88 = arith.mulf %87, %27 : f32
    %89 = vector.broadcast %88 : f32 to vector<1x8x128xf32>
    %c0_26 = arith.constant 0 : index
    %c0_27 = arith.constant 0 : index
    %c0_28 = arith.constant 0 : index
    %90 = vector.load %arg3[%c0_26, %c0_27, %c0_28] : memref<1x8x128xf32, #tpu.memory_space<vmem>>, vector<1x8x128xf32>
    tpu.vector_store %arg3[%c0_26, %c0_27, %c0_28], %89 {strides = array<i32>} : memref<1x8x128xf32, #tpu.memory_space<vmem>>, vector<1x8x128xf32>,
    return
  }
  func.func @transform_0(%arg0: i32) -> (i32, i32, i32) {
    %c0_i32 = arith.constant 0 : i32
    %c0_i32_0 = arith.constant 0 : i32
    %c0_i32_1 = arith.constant 0 : i32
    return %arg0, %c0_i32, %c0_i32_0 : i32, i32, i32
  }
  func.func @transform_1(%arg0: i32) -> (i32, i32, i32) {
    %c0_i32 = arith.constant 0 : i32
    %c0_i32_0 = arith.constant 0 : i32
    %c0_i32_1 = arith.constant 0 : i32
    return %arg0, %c0_i32, %c0_i32_0 : i32, i32, i32
  }
  func.func @transform_2(%arg0: i32) -> (i32, i32, i32) {
    %c0_i32 = arith.constant 0 : i32
    %c0_i32_0 = arith.constant 0 : i32
    %c0_i32_1 = arith.constant 0 : i32
    return %arg0, %c0_i32, %c0_i32_0 : i32, i32, i32
  }
}

</mosaic_0001>

<bundles_post_ra>
// kernel: tpu_custom_call.1
= control target key start
LH: loop header
LB: loop body
LE: loop exit
PB: predicated region body
PF: predicated region fallthrough
CT: control target
= control target key end

     0   :  { %7 = vsyncpa [#allocation3], 0  ;;  %s1985_s0 = inlined_call_operand.hbm [shape: f32[2,64,128], index: 0, kind: input, shape index: {}]   ;;  %s1986_s1 = inlined_call_operand.hbm [shape: f32[2,64,128], index: 1, kind: input, shape index: {}]   ;;  %s1987_s2 = inlined_call_operand.hbm [shape: f32[2,8,128], index: 2, kind: output, shape index: {}]  }
   0x1   :  { %9 = vsyncpa [#allocation3 + $0x1], 0 }
   0x2   :  { %10 = vsyncpa [#allocation6], 0 }
   0x3   :  { %12 = vsyncpa [#allocation6 + $0x1], 0 }
   0x4   :  { %13 = vsyncpa [#allocation4], 0 }
   0x5   :  { %15 = vsyncpa [#allocation4 + $0x1], 0  ;;  %s1139_s9 = smov 0   ;;  %s1141_s10 = smov 0  }
   0x6   :  { %s1143_s11 = smov 0   ;;  %s1145_s12 = smov 0  }
   0x7 LB: > { %s1160_s13 = sadd.s32 4294967295, %s1115_s12   ;;  %s833_s14 = sadd.s32 4294967294, %s1115_s12   ;;  %s1115_s12 = sphi %s1145_s12, %s2048_s12   ;;  %s1111_s11 = sphi %s1143_s11, %s2047_s11   ;;  %s1107_s10 = sphi %s1141_s10, %s2046_s10   ;;  %s1103_s9 = sphi %s1139_s9, %s2045_s9  }
   0x8   : > { %s1164_s15 = sadd.s32 1, %s1115_s12   ;;  %s28_s16 = sadd.s32 1, %s1111_s11 }
   0x9   : > { %s25_s17 = ssub.s32 %s1115_s12, %s1164_s15  ;;  %p35_p0 = scmp.ne.s32.totalorder %s1111_s11, %s1107_s10 }
   0xa   : > { %p26_p1 = scmp.eq.s32.totalorder %s25_s17, 0  ;;  %p36_p2 = scmp.eq.s32.totalorder %s1115_s12, 0 }
   0xb   : > { %p41_p3 = scmp.ne.s32.totalorder %s1107_s10, %s1103_s9  ;;  %p42_p4 = scmp.eq.s32.totalorder %s1160_s13, 0 }
   0xc   : > { %s1176_s18 = scalar_select %p26_p1, %s1111_s11, %s28_s16  }
   0xd   : > { %p1178_p5 = por %p36_p2, %p35_p0  ;;  %p1182_p6 = por %p42_p4, %p41_p3 }
   0xe   : > { %p91_p7 = scmp.eq.s32.totalorder %s1160_s13, 1  ;;  %p97_p8 = scmp.eq.s32.totalorder %s833_s14, 1 }
   0xf   : > { %s1999_s20 = scalar_select %p1182_p6, 1, 0 }
  0x10   : > { %p879_p10 = scmp.lt.s32.totalorder %s1115_s12, 2  ;;  %p1189_p11 = por %p91_p7, %p35_p0 }
  0x11   : > { %p1193_p12 = por %p97_p8, %p41_p3  ;;  %s1198_s23 = sand.u32 1, %s1111_s11  }
  0x12   : > { %s2000_s21 = scalar_select %p1189_p11, 1, 0 }
  0x13   : > { %s2001_s22 = scalar_select %p1193_p12, 1, 0 }
  0x14   : > { %s850_s24 = sshll.u32 %s1115_s12, 10  ;;  %s836_s25 = sshll.u32 %s1198_s23, 6 }
  0x15   : > { %s1207_s28 = scalar_lea.hbm %s1985_s0, %s850_s24  ;;  %s121_s29 = scalar_lea.vmem [#allocation2], %s836_s25 }
  0x16   : > { %s128_s30 = sshll.u32 %s121_s29, 4  ;;  %p1213_p13 = pnand %p879_p10, %p1178_p5  ;;  %s1217_s30 = int_to_ptr.vmem [resolvable:$true] %s128_s30 }
  0x17   : > { %s118_s4 = scalar_lea.sflag [#allocation3], %s1198_s23  ;;  %s985_s5 = scalar_lea.hbm %s1207_s28, 1024 }
  0x18   : > { %p986_p0 = scmp.ne.s32.totalorder %s1207_s28, %s985_s5  ;;  %p987_p1 = pneg %p1213_p13 }
  0x19   : > { %s990_s8 = scalar_lea.hbm %s1985_s0, 2048  ;;  %p991_p4 = scmp.lt.u32.totalorder %s1207_s28, %s1985_s0 }
  0x1a   : > { %p988_p2 = pnand %p987_p1, %p986_p0  ;;  %p992_p5 = scmp.lt.u32.totalorder %s990_s8, %s985_s5 }
  0x1b   : > { %p994_p8 = scmp.lt.u32.totalorder %s985_s5, %s1207_s28 }
  0x1c   : > { %p989_p3 = pneg %p988_p2  ;;  %p993_p7 = por %p992_p5, %p991_p4 }
  0x1e   : > { %p995_p10 = por %p994_p8, %p993_p7 }
  0x20   : > { %p996_p9 = pnand %p995_p10, %p989_p3 }
  0x22   : > { %999 = shalt.err (!%p996_p9)
}
  0x23   : > { %s1000_s17 = scalar_lea.vmem %s1217_s30, 1024  ;;  %s1117_s19 = smov [#allocation2]  }
  0x24   : > { %p1001_p0 = scmp.ne.s32.totalorder %s1217_s30, %s1000_s17  ;;  %s1005_s26 = sshll.u32 %s1117_s19, 4  ;;  %s1006_s26 = int_to_ptr.vmem [resolvable:$false] %s1005_s26 }
  0x25   : > { %s1007_s27 = scalar_lea.vmem %s1006_s26, 2048  ;;  %p1008_p11 = scmp.lt.s32.totalorder %s1217_s30, %s1006_s26 }
  0x26   : > { %p1003_p2 = pnand %p1001_p0, %p987_p1  ;;  %p1009_p4 = scmp.lt.s32.totalorder %s1007_s27, %s1000_s17 }
  0x28   : > { %p1004_p12 = pneg %p1003_p2  ;;  %p1010_p5 = por %p1009_p4, %p1008_p11 }
  0x2a   : > { %p1011_p7 = pnand %p1010_p5, %p1004_p12 }
  0x2c   : > { %1014 = shalt.err (!%p1011_p7)
}
  0x2d   : > { %s1118_s29 = smov 128   ;;  %s1119_s5 = smov 8  }
  0x2e   : > { %871 = dma.hbm_to_vmem [thread:$0]  (!%p1213_p13), %s1207_s28, 1024, %s1217_s30, %s118_s4, %s1118_s29, %s1118_s29, %s1119_s5  }
  0x2f   : > { %p842_p9 = scmp.ge.s32.totalorder %s1115_s12, 1  ;;  %p157_p11 = scmp.lt.s32.totalorder %s1115_s12, 3 }
  0x30   : > { %s1261_s14 = scalar_lea.hbm %s1986_s1, %s850_s24  ;;  %s142_s16 = scalar_lea.vmem [#allocation5], %s836_s25 }
  0x31   : > { %p1252_p12 = pnand %p842_p9, %p157_p11  ;;  %s149_s17 = sshll.u32 %s142_s16, 4  ;;  %s1265_s17 = int_to_ptr.vmem [resolvable:$true] %s149_s17 }
  0x32   : > { %s139_s28 = scalar_lea.sflag [#allocation6], %s1198_s23  ;;  %s1015_s30 = scalar_lea.hbm %s1261_s14, 1024 }
  0x33   : > { %p1016_p3 = scmp.ne.s32.totalorder %s1261_s14, %s1015_s30  ;;  %s1020_s24 = scalar_lea.hbm %s1986_s1, 2048 }
  0x34   : > { %p1021_p0 = scmp.lt.u32.totalorder %s1261_s14, %s1986_s1  ;;  %p1022_p2 = scmp.lt.u32.totalorder %s1020_s24, %s1015_s30 }
  0x35   : > { %p1018_p8 = pnand %p1016_p3, %p987_p1  ;;  %p1024_p5 = scmp.lt.u32.totalorder %s1015_s30, %s1261_s14 }
  0x36   : > { %p1023_p4 = por %p1022_p2, %p1021_p0 }
  0x37   : > { %p1019_p10 = pneg %p1018_p8 }
  0x38   : > { %p1025_p7 = por %p1024_p5, %p1023_p4 }
  0x3a   : > { %p1026_p9 = pnand %p1025_p7, %p1019_p10 }
  0x3c   : > { %1029 = shalt.err (!%p1026_p9)
}
  0x3d   : > { %s1030_s25 = scalar_lea.vmem %s1265_s17, 1024  ;;  %s1120_s7 = smov [#allocation5]  }
  0x3e   : > { %p1031_p11 = scmp.ne.s32.totalorder %s1265_s17, %s1030_s25  ;;  %s1035_s8 = sshll.u32 %s1120_s7, 4  ;;  %s1036_s8 = int_to_ptr.vmem [resolvable:$false] %s1035_s8 }
  0x3f   : > { %s1037_s16 = scalar_lea.vmem %s1036_s8, 2048  ;;  %p1038_p6 = scmp.lt.s32.totalorder %s1265_s17, %s1036_s8 }
  0x40   : > { %p1033_p3 = pnand %p1031_p11, %p987_p1  ;;  %p1039_p0 = scmp.lt.s32.totalorder %s1037_s16, %s1030_s25 }
  0x42   : > { %p1034_p8 = pneg %p1033_p3  ;;  %p1040_p2 = por %p1039_p0, %p1038_p6 }
  0x44   : > { %p1041_p4 = pnand %p1040_p2, %p1034_p8 }
  0x46   : > { %1044 = shalt.err (!%p1041_p4)
}
  0x47   : > { %874 = dma.hbm_to_vmem [thread:$0]  (!%p1213_p13), %s1261_s14, 1024, %s1265_s17, %s139_s28, %s1118_s29, %s1118_s29, %s1119_s5  }
  0x48   : > { %161 = sbr.rel (%p1252_p12) target bundleno = 721 (0x2d1), region = 28 }
  0x4f   : > { %s1299_s30 = sand.u32 1, %s1107_s10   ;;  %p2004_p6 = scmp.ne.s32.totalorder %s1999_s20, 0 }
  0x50   : > { %s843_s4 = sshll.u32 %s1299_s30, 6  ;;  %s164_s19 = scalar_lea.sflag [#allocation3], %s1299_s30 }
  0x51   : > { %s167_s3 = scalar_lea.vmem [#allocation2], %s843_s4 }
  0x52   : > { %1090 = dma.done.wait (%p2004_p6), %s164_s19, 1024  }
  0x53   : > { %1092 = vsyncadd (%p2004_p6), %s164_s19, 4294966272  ;;  %s173_s23 = scalar_lea.sflag [#allocation6], %s1299_s30  ;;  %s176_s29 = scalar_lea.vmem [#allocation5], %s843_s4 }
  0x54   : > { %1094 = dma.done.wait (%p2004_p6), %s173_s23, 1024  }
  0x55   : > { %1096 = vsyncadd (%p2004_p6), %s173_s23, 4294966272  ;;  %v1312_v0 = vld [vmem:[%s167_s3] sm:$0xff]  ;;  %v1314_v1 = vld [vmem:[%s167_s3 + $0x8] sm:$0xff]  ;;  %v202_v30 = vlaneseq  ;;  %s1121_s20 = smov 108   ;;  %s845_s27 = sshll.u32 %s1299_s30, 3 }
  0x56   : > { %v1316_v2 = vld [vmem:[%s167_s3 + $0x10] sm:$0xff]  ;;  %v256_v3 = vadd.f32 %v1314_v1, %v1312_v0  ;;  %v1320_v4 = vld [vmem:[%s167_s3 + $0x18] sm:$0xff]  ;;  %v1322_v5 = vld [vmem:[%s176_s29] sm:$0xff]  ;;  %v297_v58 = vrot.slane %v1312_v0, 4  ;;  %v298_v60 = vrot.slane %v1314_v1, 4  ;;  %s847_s25 = sshll.u32 %s1160_s13, 7 }
  0x57   : > { %v1325_v7 = vld [vmem:[%s176_s29 + $0x8] sm:$0xff]  ;;  %v1327_v8 = vld [vmem:[%s176_s29 + $0x10] sm:$0xff]  ;;  %v1329_v9 = vld [vmem:[%s167_s3 + $0x20] sm:$0xff]  ;;  %362 = vrot.lane.b32.xlu1 %v1322_v5, %s1121_s20  ;;  %v1364_v32 = vshrl.u32 %v202_v30, 7  ;;  %v346_v38 = vrot.slane %v1322_v5, 4  ;;  %v299_v48 = vrot.slane %v1316_v2, 4  ;;  %s1941_s23 = scalar_lea.hbm %s1987_s2, %s847_s25 }
  0x58   : > { %v257_v6 = vadd.f32 %v256_v3, %v1316_v2  ;;  %v276_v10 = vadd.f32 %v1325_v7, %v1322_v5  ;;  %v1334_v12 = vld [vmem:[%s176_s29 + $0x18] sm:$0xff]  ;;  %v1336_v13 = vld [vmem:[%s167_s3 + $0x28] sm:$0xff]  ;;  %v1340_v16 = vld [vmem:[%s176_s29 + $0x20] sm:$0xff]  ;;  %v348_v31 = vrot.slane %v1327_v8, 4  ;;  %v347_v41 = vrot.slane %v1325_v7, 4  ;;  %s201_s7 = scalar_lea.vmem [#allocation7], %s845_s27 }
  0x59   : > { %v1342_v17 = vld [vmem:[%s167_s3 + $0x30] sm:$0xff]  ;;  %v1346_v20 = vld [vmem:[%s176_s29 + $0x28] sm:$0xff]  ;;  %v1348_v21 = vld [vmem:[%s167_s3 + $0x38] sm:$0xff]  ;;  %v349_v33 = vrot.slane %v1334_v12, 4  ;;  %v350_v34 = vrot.slane %v1340_v16, 4  ;;  %vm305_vm0 = vcmp.lt.s32.totalorder %v1364_v32, 4 }
  0x5a   : > { %v258_v11 = vadd.f32 %v257_v6, %v1320_v4  ;;  %v277_v14 = vadd.f32 %v276_v10, %v1327_v8  ;;  %v1352_v24 = vld [vmem:[%s176_s29 + $0x30] sm:$0xff]  ;;  %v1356_v27 = vld [vmem:[%s176_s29 + $0x38] sm:$0xff]  ;;  %v351_v39 = vrot.slane %v1346_v20, 4  ;;  %v1403_v43 = vsel %vm305_vm0, %v346_v38, %v347_v41  ;;  %s740_s8 = sshll.u32 %s201_s7, 4  ;;  %s727_s29 = scalar_lea.sflag [#allocation4], %s1299_s30  ;;  %s1943_s8 = int_to_ptr.vmem [resolvable:$true] %s740_s8 }
  0x5b   : > { %364 = vrot.lane.b32.xlu1 %v1325_v7, %s1121_s20  ;;  %v1373_v35 = vsel %vm305_vm0, %v348_v31, %v349_v33  ;;  %v1377_v36 = vsel %vm305_vm0, %v349_v33, %v350_v34  ;;  %v353_v37 = vrot.slane %v1356_v27, 4  ;;  %v352_v44 = vrot.slane %v1352_v24, 4  ;;  %p2042_p1 = scmp.ne.s32.totalorder %s2000_s21, 0  ;;  %s1123_s13 = smov [#allocation7]  }
  0x5c   : > { %v259_v15 = vadd.f32 %v258_v11, %v1329_v9  ;;  %v278_v18 = vadd.f32 %v277_v14, %v1334_v12  ;;  %v1397_v42 = vsel %vm305_vm0, %v350_v34, %v351_v39  ;;  %v1412_v45 = vsel %vm305_vm0, %v347_v41, %v348_v31 }
  0x5d   : > { %v1390_v40 = vsel %vm305_vm0, %v353_v37, %v346_v38  ;;  %2005 = vst [vmem:[#allocation11_spill] sm:$0xff] %v1412_v45  ;;  %v1418_v46 = vsel %vm305_vm0, %v351_v39, %v352_v44  ;;  %v1430_v47 = vsel %vm305_vm0, %v352_v44, %v353_v37  ;;  %v300_v49 = vrot.slane %v1320_v4, 4 }
  0x5e   : > { %v260_v19 = vadd.f32 %v259_v15, %v1336_v13  ;;  %v279_v22 = vadd.f32 %v278_v18, %v1340_v16  ;;  %v301_v50 = vrot.slane %v1329_v9, 4  ;;  %v302_v53 = vrot.slane %v1336_v13, 4 }
  0x5f   : > { %380 = vrot.lane.b32.xlu1 %v1377_v36, %s1121_s20  ;;  %v1445_v51 = vsel %vm305_vm0, %v299_v48, %v300_v49  ;;  %v303_v54 = vrot.slane %v1342_v17, 4  ;;  %v304_v57 = vrot.slane %v1348_v21, 4  ;;  %v1494_v62 = vsel %vm305_vm0, %v297_v58, %v298_v60 }
  0x60   : > { %v261_v23 = vadd.f32 %v260_v19, %v1342_v17  ;;  %v280_v25 = vadd.f32 %v279_v22, %v1346_v20  ;;  %v1449_v52 = vsel %vm305_vm0, %v300_v49, %v301_v50  ;;  %v1459_v55 = vsel %vm305_vm0, %v301_v50, %v302_v53 }
  0x61   : > { %v1467_v56 = vsel %vm305_vm0, %v302_v53, %v303_v54  ;;  %v1481_v59 = vsel %vm305_vm0, %v303_v54, %v304_v57  ;;  %v1488_v61 = vsel %vm305_vm0, %v304_v57, %v297_v58  ;;  %v1502_v63 = vsel %vm305_vm0, %v298_v60, %v299_v48 }
  0x62   : > { %v262_v26 = vadd.f32 %v261_v23, %v1348_v21  ;;  %v281_v28 = vadd.f32 %v280_v25, %v1352_v24  ;;  %2006 = vst [vmem:[#allocation12_spill] sm:$0xff] %v1467_v56  ;;  %2007 = vst [vmem:[#allocation13_spill] sm:$0xff] %v1481_v59 }
  0x63   : > { %366 = vrot.lane.b32.xlu1 %v1327_v8, %s1121_s20  ;;  %2008 = vst [vmem:[#allocation14_spill] sm:$0xff] %v1488_v61  ;;  %2009 = vst [vmem:[#allocation15_spill] sm:$0xff] %v1502_v63 }
  0x64   : > { %263 = vadd.xlane.f32.xlu0 %v262_v26  ;;  %v282_v29 = vadd.f32 %v281_v28, %v1356_v27 }
  0x67   : > { %382 = vrot.lane.b32.xlu1 %v1397_v42, %s1121_s20 }
  0x68   : > { %283 = vadd.xlane.f32.xlu0 %v282_v29 }
  0x6b   : > { %368 = vrot.lane.b32.xlu1 %v1334_v12, %s1121_s20 }
  0x6f   : > { %384 = vrot.lane.b32.xlu1 %v1418_v46, %s1121_s20 }
  0x73   : > { %370 = vrot.lane.b32.xlu1 %v1340_v16, %s1121_s20 }
  0x77   : > { %386 = vrot.lane.b32.xlu1 %v1430_v47, %s1121_s20 }
  0x7b   : > { %374 = vrot.lane.b32.xlu1 %v1352_v24, %s1121_s20 }
  0x7e   : > { %378 = vrot.lane.b32.xlu0 %v1373_v35, %s1121_s20 }
  0x7f   : > { %376 = vrot.lane.b32.xlu1 %v1356_v27, %s1121_s20 }
  0x82   : > { %372 = vrot.lane.b32.xlu0 %v1346_v20, %s1121_s20 }
  0x83   : > { %314 = vrot.lane.b32.xlu1 %v1312_v0, %s1121_s20 }
  0x86   : > { %388 = vrot.lane.b32.xlu0 %v1390_v40, %s1121_s20 }
  0x87   : > { %330 = vrot.lane.b32.xlu1 %v1445_v51, %s1121_s20 }
  0x8a   : > { %390 = vrot.lane.b32.xlu0 %v1403_v43, %s1121_s20 }
  0x8b   : > { %318 = vrot.lane.b32.xlu1 %v1316_v2, %s1121_s20 }
  0x8e   : > { %392 = vrot.lane.b32.xlu0 %v1412_v45, %s1121_s20 }
  0x8f   : > { %320 = vrot.lane.b32.xlu1 %v1320_v4, %s1121_s20 }
  0x92   : > { %316 = vrot.lane.b32.xlu0 %v1314_v1, %s1121_s20 }
  0x93   : > { %322 = vrot.lane.b32.xlu1 %v1329_v9, %s1121_s20 }
  0x96   : > { %332 = vrot.lane.b32.xlu0 %v1449_v52, %s1121_s20 }
  0x97   : > { %338 = vrot.lane.b32.xlu1 %v1481_v59, %s1121_s20 }
  0x9a   : > { %334 = vrot.lane.b32.xlu0 %v1459_v55, %s1121_s20 }
  0x9b   : > { %326 = vrot.lane.b32.xlu1 %v1342_v17, %s1121_s20 }
  0x9e   : > { %336 = vrot.lane.b32.xlu0 %v1467_v56, %s1121_s20 }
  0x9f   : > { %328 = vrot.lane.b32.xlu1 %v1348_v21, %s1121_s20 }
  0xa2   : > { %324 = vrot.lane.b32.xlu0 %v1336_v13, %s1121_s20 }
  0xa6   : > { %340 = vrot.lane.b32.xlu0 %v1488_v61, %s1121_s20 }
  0xaa   : > { %342 = vrot.lane.b32.xlu0 %v1494_v62, %s1121_s20 }
  0xae   : > { %344 = vrot.lane.b32.xlu0 %v1502_v63, %s1121_s20  ;;  %s1045_s20 = scalar_lea.vmem %s1943_s8, 128 }
  0xaf   : > { %p1046_p13 = scmp.ne.s32.totalorder %s1943_s8, %s1045_s20 }
  0xb1   : > { %p1047_p12 = pnand %p1046_p13, %p2042_p1 }
  0xb3   : > { %p1048_p10 = pneg %p1047_p12 }
  0xc9   : > { %v1508_v34 = vpop.permute.xlu1 %362 }
  0xcd   : > { %v1510_v37 = vpop.permute.xlu1 %364 }
  0xd1   : > { %v1514_v39 = vpop.permute.xlu1 %380 }
  0xd5   : > { %v1516_v41 = vpop.permute.xlu1 %366 }
  0xd9   : > { %v1518_v48 = vpop.permute.xlu1 %382 }
  0xdd   : > { %v1520_v49 = vpop.permute.xlu1 %368 }
  0xe1   : > { %v1522_v50 = vpop.permute.xlu1 %384 }
  0xe5   : > { %v1526_v54 = vpop.permute.xlu1 %370 }
  0xe9   : > { %v1530_v58 = vpop.permute.xlu1 %386 }
  0xf1   : > { %v264_v3 = vpop.xlane.xlu0 %263 }
  0xf2   : > { %v265_v6 = vrot.slane %v264_v3, 4 }
  0xf4   : > { %v266_v10 = vadd.f32 %v265_v6, %v264_v3  ;;  %v459_v3 = vsub.f32 %v1377_v36, %v1325_v7  ;;  %v460_v6 = vsub.f32 %v1397_v42, %v1327_v8 }
  0xf5   : > { %v284_v19 = vpop.xlane.xlu0 %283 }
  0xf6   : > { %v267_v11 = vrot.slane %v266_v10, 2  ;;  %v285_v22 = vrot.slane %v284_v19, 4 }
  0xf8   : > { %v268_v14 = vadd.f32 %v267_v11, %v266_v10  ;;  %v286_v23 = vadd.f32 %v285_v22, %v284_v19  ;;  %v1538_v10 = vpop.permute.xlu1 %374  ;;  %v461_v11 = vsub.f32 %v1418_v46, %v1334_v12  ;;  %v463_v19 = vsub.f32 %v1390_v40, %v1346_v20 }
  0xf9   : > { %v1524_v53 = vpop.permute.xlu0 %378  ;;  %v464_v22 = vsub.f32 %v1403_v43, %v1352_v24 }
  0xfa   : > { %v269_v15 = vrot.slane %v268_v14, 1  ;;  %v287_v25 = vrot.slane %v286_v23, 2 }
  0xfc   : > { %v270_v18 = vadd.f32 %v269_v15, %v268_v14  ;;  %v288_v28 = vadd.f32 %v287_v25, %v286_v23  ;;  %v458_v14 = vsub.f32 %v1373_v35, %v1322_v5  ;;  %v465_v23 = vsub.f32 %v1412_v45, %v1356_v27 }
  0xfd   : > { %v1528_v57 = vpop.permute.xlu0 %372  ;;  %v1554_v25 = vand.u32 2147483647, %v459_v3  ;;  %v1572_v3 = vand.u32 2147483647, %v463_v19  ;;  %v399_v19 = vsub.f32 %v1488_v61, %v1336_v13  ;;  %v579_v61 = vsub.f32 %v1373_v35, %v1508_v34 }
  0xfe   : > { %852 = vpush %v270_v18  ;;  %v289_v29 = vrot.slane %v288_v28, 1  ;;  %v462_v18 = vsub.f32 %v1430_v47, %v1340_v16 }
 0x100   : > { %v290_v33 = vadd.f32 %v289_v29, %v288_v28  ;;  %v1559_v28 = vadd.s32 40, %v1364_v32  ;;  %v212_v29 = vand.u32 127, %v202_v30  ;;  %v1570_v45 = vand.u32 2147483647, %v462_v18 }
 0x101   : > { %v1532_v60 = vpop.permute.xlu0 %388  ;;  %v396_v32 = vsub.f32 %v1459_v55, %v1316_v2  ;;  %v397_v30 = vsub.f32 %v1467_v56, %v1320_v4  ;;  %v398_v18 = vsub.f32 %v1481_v59, %v1329_v9  ;;  %v499_v59 = vsub.f32 %v1508_v34, %v1322_v5 }
 0x102   : > { %2011 = vst [vmem:[#allocation17_spill] sm:$0xff] %v1559_v28  ;;  %vm218_vm1 = vcmp.lt.s32.totalorder %v1559_v28, 44  ;;  %vm221_vm2 = vcmp.lt.s32.totalorder %v212_v29, 108  ;;  %v1626_v34 = vand.u32 2147483647, %v399_v19 }
 0x103   : > { %v1642_v19 = vand.u32 2147483647, %v579_v61  ;;  %v502_v61 = vsub.f32 %v1520_v49, %v1334_v12 }
 0x105   : > { %v1544_v15 = vpop.permute.xlu0 %390 }
 0x12f   : > { %s853_s5 = spop %852 }
 0x130   : > { %s272_s6 = smul.f32 0.00012207031, %s853_s5  ;;  %s1049_s5 = sshll.u32 %s1123_s13, 4  ;;  %s1050_s5 = int_to_ptr.vmem [resolvable:$false] %s1049_s5 }
 0x131   : > { %p1052_p5 = scmp.lt.s32.totalorder %s1943_s8, %s1050_s5 }
 0x132   : > { %v273_v26 = vstv %s272_s6  ;;  %s1051_s6 = scalar_lea.vmem %s1050_s5, 256 }
 0x133   : > { %917 = vrcp.f32 %v273_v26  ;;  %v1556_v26 = vand.u32 2147483647, %v460_v6  ;;  %v1578_v6 = vpop.permute.xlu1 %376  ;;  %p1053_p7 = scmp.lt.s32.totalorder %s1051_s6, %s1045_s20 }
 0x135   : > { %2010 = vst [vmem:[#allocation16_spill] sm:$0xff] %v1556_v26  ;;  %p1054_p9 = por %p1053_p7, %p1052_p5 }
 0x137   : > { %p1055_p11 = pnand %p1054_p9, %p1048_p10 }
 0x13d   : > { %v918_v31 = vpop.eup %917 }
 0x13e   : > { %854 = vpush %v918_v31  ;;  %v1562_v31 = vand.u32 2147483647, %v461_v11  ;;  %v1580_v11 = vand.u32 2147483647, %v464_v22  ;;  %v400_v22 = vsub.f32 %v1494_v62, %v1342_v17 }
 0x13f   : > { %856 = vpush %v290_v33  ;;  %v1564_v33 = vand.u32 2147483647, %v458_v14  ;;  %v1582_v14 = vand.u32 2147483647, %v465_v23  ;;  %v401_v23 = vsub.f32 %v1502_v63, %v1348_v21 }
 0x140   : > { %2012 = vst [vmem:[#allocation18_spill] sm:$0xff] %v1562_v31  ;;  %2013 = vst [vmem:[#allocation19_spill] sm:$0xff] %v1580_v11  ;;  %v1584_v31 = vpop.permute.xlu0 %392  ;;  %v1601_v11 = vand.u32 2147483647, %v397_v30  ;;  %v580_v30 = vsub.f32 %v1377_v36, %v1510_v37  ;;  %v1632_v28 = vand.u32 2147483647, %v400_v22  ;;  %v501_v36 = vsub.f32 %v1516_v41, %v1327_v8 }
 0x141   : > { %2014 = vst [vmem:[#allocation20_spill] sm:$0xff] %v1582_v14  ;;  %v1599_v14 = vand.u32 2147483647, %v396_v32  ;;  %v500_v32 = vsub.f32 %v1510_v37, %v1325_v7  ;;  %v1634_v63 = vand.u32 2147483647, %v401_v23  ;;  %v539_v37 = vsub.f32 %v1524_v53, %v1322_v5 }
 0x142   : > { %2018 = vst [vmem:[#allocation24_spill] sm:$0xff] %v1601_v11  ;;  %v1620_v11 = vand.u32 2147483647, %v398_v18  ;;  %v1640_v18 = vand.u32 2147483647, %v499_v59  ;;  %v584_v5 = vsub.f32 %v1390_v40, %v1528_v57  ;;  %v545_v40 = vsub.f32 %v1544_v15, %v1352_v24 }
 0x143   : > { %2017 = vst [vmem:[#allocation23_spill] sm:$0xff] %v1599_v14  ;;  %v540_v14 = vsub.f32 %v1514_v39, %v1325_v7  ;;  %2020 = vst [vmem:[#allocation26_spill] sm:$0xff] %v1634_v63  ;;  %v581_v7 = vsub.f32 %v1397_v42, %v1516_v41  ;;  %v504_v39 = vsub.f32 %v1528_v57, %v1346_v20  ;;  %v1648_v22 = vand.u32 2147483647, %v500_v32 }
 0x144   : > { %v317_v29 = vpop.permute.xlu0 %316  ;;  %v1650_v23 = vand.u32 2147483647, %v580_v30  ;;  %v582_v42 = vsub.f32 %v1418_v46, %v1520_v49  ;;  %v544_v41 = vsub.f32 %v1532_v60, %v1346_v20  ;;  %v1664_v53 = vand.u32 2147483647, %v501_v36 }
 0x145   : > { %v1656_v59 = vand.u32 2147483647, %v540_v14  ;;  %v542_v32 = vsub.f32 %v1522_v50, %v1334_v12  ;;  %v503_v57 = vsub.f32 %v1526_v54, %v1340_v16  ;;  %v512_v14 = vand.u32 2147483647, %v504_v39 }
 0x146   : > { %v546_v46 = vsub.f32 %v1584_v31, %v1356_v27  ;;  %v583_v12 = vsub.f32 %v1430_v47, %v1526_v54  ;;  %v1682_v50 = vand.u32 2147483647, %v584_v5  ;;  %v1684_v15 = vand.u32 2147483647, %v502_v61 }
 0x147   : > { %v1686_v30 = vand.u32 2147483647, %v582_v42  ;;  %v1688_v36 = vand.u32 2147483647, %v544_v41  ;;  %v1691_v31 = vand.u32 2147483647, %v542_v32  ;;  %v443_v47 = vsub.f32 %v1449_v52, %v317_v29 }
 0x148   : > { %v333_v60 = vpop.permute.xlu0 %332  ;;  %v511_v54 = vand.u32 2147483647, %v503_v57  ;;  %v505_v39 = vsub.f32 %v1538_v10, %v1352_v24  ;;  %v585_v5 = vsub.f32 %v1403_v43, %v1538_v10  ;;  %v1702_v61 = vand.u32 2147483647, %v546_v46  ;;  %v2021_v32 = vld [vmem:[#allocation11_spill] sm:$0xff] }
 0x149   : > { %v591_v42 = vand.u32 2147483647, %v583_v12  ;;  %v506_v41 = vsub.f32 %v1578_v6, %v1356_v27  ;;  %v1719_v57 = vand.u32 2147483647, %v443_v47  ;;  %v427_v27 = vsub.f32 %v333_v60, %v1314_v1 }
 0x14a   : > { %v513_v12 = vand.u32 2147483647, %v505_v39 }
 0x14b   : > { %2022 = vst [vmem:[#allocation11_spill] sm:$0xff] %v1719_v57 }
 0x14c   : > { %v335_v46 = vpop.permute.xlu0 %334 }
 0x16f   : > { %s1512_s14 = spop %854 }
 0x170   : > { %s857_s17 = spop %856 }
 0x171   : > { %s292_s28 = smul.f32 0.00012207031, %s857_s17 }
 0x173   : > { %v293_v38 = vstv %s292_s28 }
 0x174   : > { %919 = vrcp.f32 %v293_v38  ;;  %v394_v38 = vsub.f32 %v1445_v51, %v1312_v0 }
 0x176   : > { %v1591_v26 = vand.u32 2147483647, %v394_v38  ;;  %v1996_v38 = vmov 0.0  }
 0x177   : > { %v1624_v35 = vsel %vm221_vm2, 0.0004208754, %v1996_v38 }
 0x178   : > { %2015 = vst [vmem:[#allocation21_spill] sm:$0xff] %v1591_v26  ;;  %2019 = vst [vmem:[#allocation25_spill] sm:$0xff] %v1624_v35  ;;  %v1630_v26 = vpop.permute.xlu1 %314  ;;  %v2026_v35 = vld [vmem:[#allocation12_spill] sm:$0xff] }
 0x179   : > { %v442_v24 = vsub.f32 %v1445_v51, %v1630_v26 }
 0x17c   : > { %v331_v20 = vpop.permute.xlu1 %330 }
 0x17d   : > { %v426_v43 = vsub.f32 %v331_v20, %v1312_v0 }
 0x17e   : > { %v920_v44 = vpop.eup %919 }
 0x17f   : > { %858 = vpush %v920_v44  ;;  %v395_v44 = vsub.f32 %v1449_v52, %v1314_v1  ;;  %v410_v52 = vsub.f32 %v1630_v26, %v1312_v0  ;;  %v1736_v60 = vand.u32 2147483647, %v426_v43 }
 0x180   : > { %v319_v10 = vpop.permute.xlu1 %318 }
 0x181   : > { %v1593_v56 = vand.u32 2147483647, %v395_v44  ;;  %v1610_v44 = vsel %vm218_vm1, 0.00035511365, %v1996_v38  ;;  %v444_v20 = vsub.f32 %v1459_v55, %v319_v10  ;;  %v1732_v47 = vand.u32 2147483647, %v410_v52 }
 0x183   : > { %2016 = vst [vmem:[#allocation22_spill] sm:$0xff] %v1593_v56  ;;  %v1614_v56 = vsel %vm221_vm2, 0.00028935185, %v1996_v38  ;;  %v541_v38 = vsub.f32 %v1518_v48, %v1327_v8  ;;  %v1668_v8 = vand.u32 2147483647, %v539_v37  ;;  %v411_v37 = vsub.f32 %v317_v29, %v1314_v1 }
 0x184   : > { %v1672_v48 = vand.u32 2147483647, %v581_v7  ;;  %v1695_v7 = vand.u32 2147483647, %v545_v40  ;;  %v1734_v1 = vand.u32 2147483647, %v442_v24 }
 0x185   : > { %v1678_v49 = vand.u32 2147483647, %v541_v38  ;;  %v543_v38 = vsub.f32 %v1530_v58, %v1340_v16  ;;  %v586_v16 = vsub.f32 %v2021_v32, %v1578_v6  ;;  %v1714_v29 = vand.u32 2147483647, %v411_v37 }
 0x186   : > { %v412_v6 = vsub.f32 %v319_v10, %v1316_v2  ;;  %v1723_v32 = vand.u32 2147483647, %v585_v5  ;;  %v514_v37 = vand.u32 2147483647, %v506_v41  ;;  %v1740_v5 = vand.u32 2147483647, %v427_v27  ;;  %v321_v41 = vpop.permute.xlu1 %320  ;;  %v337_v10 = vpop.permute.xlu0 %336 }
 0x187   : > { %v1717_v40 = vand.u32 2147483647, %v543_v38  ;;  %v1728_v0 = vand.u32 2147483647, %v586_v16  ;;  %v428_v38 = vsub.f32 %v335_v46, %v1316_v2  ;;  %v1750_v43 = vand.u32 2147483647, %v444_v20 }
 0x188   : > { %v2024_v27 = vld [vmem:[#allocation16_spill] sm:$0xff]  ;;  %v2027_v20 = vld [vmem:[#allocation19_spill] sm:$0xff] }
 0x189   : > { %2023 = vst [vmem:[#allocation27_spill] sm:$0xff] %v1750_v43 }
 0x1b0   : > { %s859_s24 = spop %858 }
 0x1b1   : > { %s296_s26 = ssub.f32 0.0, %s859_s24 }
 0x1b3   : > { %v1708_v58 = vstv %s296_s26 }
 0x1b4   : > { %v479_v51 = vmul.f32 %v1708_v58, %v1570_v45  ;;  %v519_v26 = vmul.f32 %v511_v54, %v1708_v58  ;;  %v480_v39 = vmul.f32 %v1708_v58, %v1572_v3  ;;  %v1742_v45 = vand.u32 2147483647, %v412_v6 }
 0x1b5   : > { %v475_v54 = vmul.f32 %v1708_v58, %v1564_v33  ;;  %v599_v55 = vmul.f32 %v591_v42, %v1708_v58  ;;  %v476_v2 = vmul.f32 %v1708_v58, %v1554_v25  ;;  %v520_v16 = vmul.f32 %v512_v14, %v1708_v58  ;;  %v2025_v42 = vld [vmem:[#allocation18_spill] sm:$0xff] }
 0x1b6   : > { %v491_v52 = vmul.f32 1.442695, %v479_v51  ;;  %v531_v24 = vmul.f32 1.442695, %v519_v26  ;;  %v1752_v3 = vand.u32 2147483647, %v428_v38  ;;  %v477_v6 = vmul.f32 %v1708_v58, %v2024_v27 }
 0x1b7   : > { %v611_v46 = vmul.f32 1.442695, %v599_v55  ;;  %v413_v33 = vsub.f32 %v321_v41, %v1320_v4  ;;  %v478_v63 = vmul.f32 %v1708_v58, %v2025_v42  ;;  %v493_v25 = vmul.f32 1.442695, %v480_v39  ;;  %v2028_v55 = vld [vmem:[#allocation20_spill] sm:$0xff] }
 0x1b8   : > { %921 = vpow2.f32 %v491_v52  ;;  %v445_v14 = vsub.f32 %v2026_v35, %v321_v41  ;;  %v429_v51 = vsub.f32 %v337_v10, %v1320_v4  ;;  %v483_v26 = vmul.f32 1.442695, %v475_v54  ;;  %v1771_v35 = vpop.permute.xlu1 %322 }
 0x1b9   : > { %923 = vpow2.f32 %v531_v24  ;;  %v481_v38 = vmul.f32 %v1708_v58, %v2027_v20  ;;  %v485_v43 = vmul.f32 1.442695, %v476_v2  ;;  %v533_v27 = vmul.f32 1.442695, %v520_v16  ;;  %v1779_v24 = vpop.permute.xlu0 %324 }
 0x1ba   : > { %925 = vpow2.f32 %v611_v46  ;;  %v482_v57 = vmul.f32 %v1708_v58, %v2028_v55  ;;  %v600_v42 = vmul.f32 %v1682_v50, %v1708_v58  ;;  %v487_v52 = vmul.f32 1.442695, %v477_v6  ;;  %v2030_v55 = vld [vmem:[#allocation14_spill] sm:$0xff] }
 0x1bb   : > { %927 = vpow2.f32 %v493_v25  ;;  %v1767_v39 = vand.u32 2147483647, %v413_v33  ;;  %v515_v4 = vmul.f32 %v1640_v18, %v1708_v58  ;;  %v489_v54 = vmul.f32 1.442695, %v478_v63 }
 0x1bc   : > { %929 = vpow2.f32 %v533_v27  ;;  %v1773_v41 = vand.u32 2147483647, %v445_v14  ;;  %v1775_v2 = vand.u32 2147483647, %v429_v51  ;;  %v516_v16 = vmul.f32 %v1648_v22, %v1708_v58  ;;  %v2029_v14 = vld [vmem:[#allocation13_spill] sm:$0xff]  ;;  %v339_v20 = vpop.permute.xlu1 %338 }
 0x1bd   : > { %931 = vpow2.f32 %v483_v26  ;;  %v517_v50 = vmul.f32 %v1664_v53, %v1708_v58  ;;  %v414_v18 = vsub.f32 %v1771_v35, %v1329_v9  ;;  %v495_v10 = vmul.f32 1.442695, %v481_v38 }
 0x1be   : > { %933 = vpow2.f32 %v485_v43  ;;  %v518_v63 = vmul.f32 %v1684_v15, %v1708_v58  ;;  %v497_v6 = vmul.f32 1.442695, %v482_v57  ;;  %v613_v46 = vmul.f32 1.442695, %v600_v42 }
 0x1bf   : > { %935 = vpow2.f32 %v487_v52  ;;  %v521_v33 = vmul.f32 %v513_v12, %v1708_v58  ;;  %v523_v22 = vmul.f32 1.442695, %v515_v4  ;;  %v415_v25 = vsub.f32 %v1779_v24, %v1336_v13  ;;  %v1805_v52 = vpop.permute.xlu0 %340 }
 0x1c0   : > { %937 = vpow2.f32 %v489_v54  ;;  %v522_v53 = vmul.f32 %v514_v37, %v1708_v58  ;;  %v446_v51 = vsub.f32 %v2029_v14, %v1771_v35  ;;  %v525_v26 = vmul.f32 1.442695, %v516_v16 }
 0x1c1   : > { %939 = vpow2.f32 %v613_v46  ;;  %v555_v15 = vmul.f32 %v1668_v8, %v1708_v58  ;;  %v1797_v57 = vand.u32 2147483647, %v414_v18  ;;  %v527_v12 = vmul.f32 1.442695, %v517_v50 }
 0x1c2   : > { %v1793_v43 = vpop.eup %921  ;;  %941 = vpow2.f32 %v495_v10  ;;  %v556_v37 = vmul.f32 %v1656_v59, %v1708_v58  ;;  %v529_v27 = vmul.f32 1.442695, %v518_v63  ;;  %v447_v42 = vsub.f32 %v2030_v55, %v1779_v24 }
 0x1c3   : > { %v1799_v38 = vpop.eup %923  ;;  %943 = vpow2.f32 %v497_v6  ;;  %v557_v8 = vmul.f32 %v1678_v49, %v1708_v58  ;;  %v535_v35 = vmul.f32 1.442695, %v521_v33  ;;  %v423_v54 = vand.u32 2147483647, %v415_v25 }
 0x1c4   : > { %v1807_v4 = vpop.eup %925  ;;  %945 = vpow2.f32 %v523_v22  ;;  %v558_v50 = vmul.f32 %v1691_v31, %v1708_v58  ;;  %v537_v59 = vmul.f32 1.442695, %v522_v53  ;;  %v430_v18 = vsub.f32 %v339_v20, %v1329_v9  ;;  %v1826_v53 = vpop.permute.xlu1 %326 }
 0x1c5   : > { %v928_v16 = vpop.eup %927  ;;  %947 = vpow2.f32 %v525_v26  ;;  %v559_v10 = vmul.f32 %v1717_v40, %v1708_v58  ;;  %v563_v63 = vmul.f32 1.442695, %v555_v15  ;;  %v560_v46 = vmul.f32 %v1688_v36, %v1708_v58  ;;  %v343_v15 = vpop.permute.xlu0 %342 }
 0x1c6   : > { %v930_v24 = vpop.eup %929  ;;  %v624_v6 = vmul.f32 %v928_v16, %v1626_v34  ;;  %949 = vpow2.f32 %v527_v12  ;;  %v565_v33 = vmul.f32 1.442695, %v556_v37  ;;  %v561_v9 = vmul.f32 %v1695_v7, %v1708_v58 }
 0x1c7   : > { %v1817_v49 = vpop.eup %931  ;;  %v640_v22 = vmul.f32 %v930_v24, %v423_v54  ;;  %951 = vpow2.f32 %v529_v27  ;;  %v567_v25 = vmul.f32 1.442695, %v557_v8  ;;  %v562_v14 = vmul.f32 %v1702_v61, %v1708_v58 }
 0x1c8   : > { %v1821_v31 = vpop.eup %933  ;;  %v632_v40 = vmul.f32 %v624_v6, %v1610_v44  ;;  %953 = vpow2.f32 %v535_v35  ;;  %v569_v36 = vmul.f32 1.442695, %v558_v50  ;;  %v595_v7 = vmul.f32 %v1642_v19, %v1708_v58 }
 0x1c9   : > { %v1828_v34 = vpop.eup %935  ;;  %v648_v26 = vmul.f32 %v640_v22, %v1614_v56  ;;  %955 = vpow2.f32 %v537_v59  ;;  %v1837_v20 = vand.u32 2147483647, %v446_v51  ;;  %v571_v44 = vmul.f32 1.442695, %v559_v10 }
 0x1ca   : > { %v1833_v12 = vpop.eup %937  ;;  %957 = vpow2.f32 %v563_v63  ;;  %v596_v27 = vmul.f32 %v1650_v23, %v1708_v58  ;;  %v573_v61 = vmul.f32 1.442695, %v560_v46  ;;  %v597_v35 = vmul.f32 %v1672_v48, %v1708_v58 }
 0x1cb   : > { %v1839_v37 = vpop.eup %939  ;;  %v1843_v55 = vadd.f32 %v648_v26, %v632_v40  ;;  %959 = vpow2.f32 %v565_v33  ;;  %v575_v54 = vmul.f32 1.442695, %v561_v9  ;;  %v455_v19 = vand.u32 2147483647, %v447_v42  ;;  %v329_v42 = vpop.permute.xlu1 %328 }
 0x1cc   : > { %v1845_v8 = vpop.eup %941  ;;  %961 = vpow2.f32 %v567_v25  ;;  %v598_v16 = vmul.f32 %v1686_v30, %v1708_v58  ;;  %v577_v50 = vmul.f32 1.442695, %v562_v14  ;;  %v1853_v23 = vand.u32 2147483647, %v430_v18  ;;  %v345_v18 = vpop.permute.xlu0 %344 }
 0x1cd   : > { %v1849_v51 = vpop.eup %943  ;;  %963 = vpow2.f32 %v569_v36  ;;  %v601_v24 = vmul.f32 %v1723_v32, %v1708_v58  ;;  %v603_v10 = vmul.f32 1.442695, %v595_v7  ;;  %v431_v48 = vsub.f32 %v1805_v52, %v1336_v13 }
 0x1ce   : > { %v946_v59 = vpop.eup %945  ;;  %965 = vpow2.f32 %v571_v44  ;;  %v602_v6 = vmul.f32 %v1728_v0, %v1708_v58  ;;  %v605_v46 = vmul.f32 1.442695, %v596_v27  ;;  %v416_v30 = vsub.f32 %v1826_v53, %v1342_v17  ;;  %v2031_v58 = vld [vmem:[#allocation15_spill] sm:$0xff] }
 0x1cf   : > { %v948_v63 = vpop.eup %947  ;;  %967 = vpow2.f32 %v573_v61  ;;  %v607_v22 = vmul.f32 1.442695, %v597_v35  ;;  %v448_v32 = vsub.f32 %v1494_v62, %v1826_v53  ;;  %v432_v9 = vsub.f32 %v343_v15, %v1342_v17  ;;  %v2034_v61 = vld [vmem:[#allocation21_spill] sm:$0xff] }
 0x1d0   : > { %v950_v33 = vpop.eup %949  ;;  %969 = vpow2.f32 %v575_v54  ;;  %v609_v52 = vmul.f32 1.442695, %v598_v16  ;;  %v417_v25 = vsub.f32 %v329_v42, %v1348_v21  ;;  %v449_v0 = vsub.f32 %v2031_v58, %v329_v42 }
 0x1d1   : > { %v952_v13 = vpop.eup %951  ;;  %971 = vpow2.f32 %v577_v50  ;;  %v615_v14 = vmul.f32 1.442695, %v601_v24  ;;  %v2032_v36 = vmov 0.0   ;;  %v433_v44 = vsub.f32 %v345_v18, %v1348_v21 }
 0x1d2   : > { %v1868_v40 = vpop.eup %953  ;;  %973 = vpow2.f32 %v603_v10  ;;  %v236_v7 = vsel %vm218_vm1, 1.0, %v2032_v36  ;;  %v617_v17 = vmul.f32 1.442695, %v602_v6  ;;  %v439_v53 = vand.u32 2147483647, %v431_v48  ;;  %v2035_v6 = vld [vmem:[#allocation22_spill] sm:$0xff] }
 0x1d3   : > { %v1874_v62 = vpop.eup %955  ;;  %975 = vpow2.f32 %v605_v46  ;;  %v1876_v15 = vand.u32 2147483647, %v416_v30  ;;  %v619_v35 = vmul.f32 %v1817_v49, %v2034_v61  ;;  %v635_v54 = vmul.f32 %v946_v59, %v1732_v47  ;;  %v2036_v46 = vld [vmem:[#allocation23_spill] sm:$0xff] }
 0x1d4   : > { %v958_v27 = vpop.eup %957  ;;  %977 = vpow2.f32 %v607_v22  ;;  %v1881_v16 = vand.u32 2147483647, %v448_v32  ;;  %v623_v21 = vmul.f32 %v1793_v43, %v1620_v11  ;;  %v440_v24 = vand.u32 2147483647, %v432_v9  ;;  %v2037_v32 = vld [vmem:[#allocation24_spill] sm:$0xff] }
 0x1d5   : > { %v960_v50 = vpop.eup %959  ;;  %979 = vpow2.f32 %v609_v52  ;;  %v1885_v10 = vand.u32 2147483647, %v417_v25  ;;  %v639_v42 = vmul.f32 %v1799_v38, %v1797_v57  ;;  %v620_v49 = vmul.f32 %v1821_v31, %v2035_v6 }
 0x1d6   : > { %v962_v48 = vpop.eup %961  ;;  %981 = vpow2.f32 %v615_v14  ;;  %v636_v47 = vmul.f32 %v948_v63, %v1714_v29  ;;  %v621_v30 = vmul.f32 %v1828_v34, %v2036_v46  ;;  %v637_v11 = vmul.f32 %v950_v33, %v1742_v45 }
 0x1d7   : > { %v964_v59 = vpop.eup %963  ;;  %983 = vpow2.f32 %v617_v17  ;;  %v457_v43 = vand.u32 2147483647, %v449_v0  ;;  %v672_v22 = vmul.f32 %v1839_v37, %v455_v19  ;;  %v622_v57 = vmul.f32 %v1833_v12, %v2037_v32 }
 0x1d8   : > { %v966_v18 = vpop.eup %965  ;;  %v627_v38 = vmul.f32 0.00035511365, %v619_v35  ;;  %v643_v9 = vmul.f32 %v635_v54, %v1614_v56  ;;  %v631_v52 = vmul.f32 0.00035511365, %v623_v21  ;;  %v671_v29 = vmul.f32 %v1807_v4, %v1837_v20 }
 0x1d9   : > { %v968_v31 = vpop.eup %967  ;;  %v638_v63 = vmul.f32 %v952_v13, %v1767_v39  ;;  %v441_v34 = vand.u32 2147483647, %v433_v44  ;;  %v647_v45 = vmul.f32 %v639_v42, %v1614_v56  ;;  %v628_v58 = vmul.f32 0.00035511365, %v620_v49 }
 0x1da   : > { %v970_v25 = vpop.eup %969  ;;  %v664_v33 = vmul.f32 %v968_v31, %v439_v53  ;;  %v644_v37 = vmul.f32 %v636_v47, %v1614_v56  ;;  %v625_v12 = vmul.f32 %v1845_v8, %v1632_v28  ;;  %v659_v0 = vmul.f32 %v958_v27, %v1736_v60  ;;  %v2038_v27 = vld [vmem:[#allocation11_spill] sm:$0xff] }
 0x1db   : > { %v972_v19 = vpop.eup %971  ;;  %v629_v14 = vmul.f32 0.00035511365, %v621_v30  ;;  %v645_v36 = vmul.f32 %v637_v11, %v1614_v56  ;;  %v660_v39 = vmul.f32 %v960_v50, %v1740_v5  ;;  %v630_v13 = vmul.f32 0.00035511365, %v622_v57  ;;  %v2039_v50 = vld [vmem:[#allocation27_spill] sm:$0xff] }
 0x1dc   : > { %v974_v4 = vpop.eup %973  ;;  %v680_v20 = vadd.f32 %v672_v22, %v664_v33  ;;  %v651_v26 = vadd.f32 %v643_v9, %v627_v38  ;;  %v663_v17 = vmul.f32 %v966_v18, %v1853_v23  ;;  %v661_v53 = vmul.f32 %v962_v48, %v1752_v3  ;;  %v2040_v48 = vld [vmem:[#allocation25_spill] sm:$0xff]  ;;  %v2041_v33 = vld [vmem:[#allocation26_spill] sm:$0xff] }
 0x1dd   : > { %v976_v44 = vpop.eup %975  ;;  %v667_v61 = vmul.f32 %v974_v4, %v1734_v1  ;;  %v646_v28 = vmul.f32 %v638_v63, %v1614_v56  ;;  %v662_v60 = vmul.f32 %v964_v59, %v1775_v2  ;;  %v652_v21 = vadd.f32 %v644_v37, %v628_v58 }
 0x1de   : > { %v978_v8 = vpop.eup %977  ;;  %v668_v35 = vmul.f32 %v976_v44, %v2038_v27  ;;  %v688_v54 = vmul.f32 %v680_v20, %v236_v7  ;;  %v653_v49 = vadd.f32 %v645_v36, %v629_v14  ;;  %v665_v47 = vmul.f32 %v970_v25, %v440_v24 }
 0x1df   : > { %v980_v5 = vpop.eup %979  ;;  %v669_v42 = vmul.f32 %v978_v8, %v2039_v50  ;;  %v675_v6 = vadd.f32 %v667_v61, %v659_v0  ;;  %v666_v30 = vmul.f32 %v972_v19, %v441_v34  ;;  %v679_v18 = vadd.f32 %v671_v29, %v663_v17 }
 0x1e0   : > { %v982_v23 = vpop.eup %981  ;;  %v670_v3 = vmul.f32 %v980_v5, %v1773_v41  ;;  %v696_v1 = vmul.f32 %v688_v54, %v2040_v48  ;;  %v676_v46 = vadd.f32 %v668_v35, %v660_v39  ;;  %v641_v41 = vmul.f32 %v1868_v40, %v1876_v15 }
 0x1e1   : > { %v984_v11 = vpop.eup %983  ;;  %v677_v2 = vadd.f32 %v669_v42, %v661_v53  ;;  %v673_v59 = vmul.f32 %v982_v23, %v1881_v16  ;;  %v691_v7 = vmul.f32 %v675_v6, %v2040_v48  ;;  %v654_v63 = vadd.f32 %v646_v28, %v630_v13 }
 0x1e2   : > { %v678_v22 = vadd.f32 %v670_v3, %v662_v60  ;;  %v692_v32 = vmul.f32 %v676_v46, %v2040_v48  ;;  %v674_v57 = vmul.f32 %v984_v11, %v457_v43  ;;  %v704_v24 = vadd.f32 %v696_v1, %v1843_v55 }
 0x1e3   : > { %v693_v38 = vmul.f32 %v677_v2, %v2040_v48  ;;  %v681_v9 = vadd.f32 %v673_v59, %v665_v47  ;;  %v699_v31 = vadd.f32 %v691_v7, %v651_v26  ;;  %v655_v25 = vadd.f32 %v647_v45, %v631_v52 }
 0x1e4   : > { %v694_v29 = vmul.f32 %v678_v22, %v2040_v48  ;;  %v700_v34 = vadd.f32 %v692_v32, %v652_v21  ;;  %v682_v16 = vadd.f32 %v674_v57, %v666_v30  ;;  %v626_v58 = vmul.f32 %v1849_v51, %v2041_v33 }
 0x1e5   : > { %v642_v43 = vmul.f32 %v1874_v62, %v1885_v10  ;;  %v695_v55 = vmul.f32 %v679_v18, %v2040_v48  ;;  %v689_v37 = vmul.f32 0.0, %v681_v9  ;;  %v701_v40 = vadd.f32 %v693_v38, %v653_v49 }
 0x1e6   : > { %v707_v15 = vadd.f32 %v700_v34, %v699_v31  ;;  %v633_v19 = vmul.f32 0.0, %v625_v12  ;;  %v649_v0 = vmul.f32 %v641_v41, %v1614_v56  ;;  %v702_v14 = vadd.f32 %v694_v29, %v654_v63 }
 0x1e7   : > { %v690_v36 = vmul.f32 0.0, %v682_v16  ;;  %v634_v39 = vmul.f32 0.0, %v626_v58  ;;  %v703_v20 = vadd.f32 %v695_v55, %v655_v25  ;;  %v650_v52 = vmul.f32 %v642_v43, %v1614_v56 }
 0x1e8   : > { %v708_v4 = vadd.f32 %v707_v15, %v701_v40  ;;  %v697_v51 = vmul.f32 %v689_v37, %v2040_v48  ;;  %v657_v13 = vadd.f32 %v649_v0, %v633_v19 }
 0x1e9   : > { %v698_v62 = vmul.f32 %v690_v36, %v2040_v48  ;;  %v658_v26 = vadd.f32 %v650_v52, %v634_v39 }
 0x1ea   : > { %v709_v45 = vadd.f32 %v708_v4, %v702_v14  ;;  %v705_v12 = vadd.f32 %v697_v51, %v657_v13 }
 0x1eb   : > { %v706_v17 = vadd.f32 %v698_v62, %v658_v26 }
 0x1ec   : > { %v710_v10 = vadd.f32 %v709_v45, %v703_v20 }
 0x1ee   : > { %v711_v44 = vadd.f32 %v710_v10, %v704_v24 }
 0x1f0   : > { %v712_v53 = vadd.f32 %v711_v44, %v705_v12 }
 0x1f2   : > { %v713_v61 = vadd.f32 %v712_v53, %v706_v17 }
 0x1f4   : > { %714 = vadd.xlane.f32.xlu1 %v713_v61 }
 0x281   : > { %v715_v28 = vpop.xlane.xlu1 %714 }
 0x282   : > { %v716_v8 = vrot.slane %v715_v28, 4 }
 0x284   : > { %v717_v56 = vadd.f32 %v716_v8, %v715_v28 }
 0x286   : > { %v718_v60 = vrot.slane %v717_v56, 2 }
 0x288   : > { %v719_v27 = vadd.f32 %v718_v60, %v717_v56 }
 0x28a   : > { %v720_v35 = vrot.slane %v719_v27, 1 }
 0x28c   : > { %v721_v54 = vadd.f32 %v720_v35, %v719_v27 }
 0x28e   : > { %860 = vpush %v721_v54 }
 0x2bf   : > { %s861_s16 = spop %860 }
 0x2c0   : > { %s723_s4 = smul.f32 %s861_s16, %s1512_s14 }
 0x2c2   : > { %v724_v21 = vstv %s723_s4 }
 0x2c3   : > { %725 = vst [vmem:[%s201_s7] sm:$0xff] %v724_v21 }
 0x2c4   : > { %1058 = shalt.err (!%p1055_p11)
}
 0x2c5   : > { %s1059_s30 = scalar_lea.hbm %s1941_s23, 128  ;;  %s1063_s28 = scalar_lea.hbm %s1987_s2, 256 }
 0x2c6   : > { %p1060_p3 = scmp.ne.s32.totalorder %s1941_s23, %s1059_s30  ;;  %p1064_p2 = scmp.lt.u32.totalorder %s1941_s23, %s1987_s2 }
 0x2c7   : > { %p1065_p4 = scmp.lt.u32.totalorder %s1063_s28, %s1059_s30  ;;  %p1067_p13 = scmp.lt.u32.totalorder %s1059_s30, %s1941_s23 }
 0x2c8   : > { %p1061_p8 = pnand %p1060_p3, %p2042_p1 }
 0x2c9   : > { %p1066_p6 = por %p1065_p4, %p1064_p2 }
 0x2ca   : > { %p1062_p0 = pneg %p1061_p8 }
 0x2cb   : > { %p1068_p12 = por %p1067_p13, %p1066_p6 }
 0x2cd   : > { %p1069_p10 = pnand %p1068_p12, %p1062_p0 }
 0x2cf   : > { %1072 = shalt.err (!%p1069_p10)
}
 0x2d0   : > { %866 = dma.vmem_to_hbm [thread:$0]  (%p2042_p1), %s1943_s8, 128, %s1941_s23, %s727_s29  }
 0x2d1 PF: > { %s752_s27 = sand.u32 1, %s1103_s9   ;;  %p2043_p5 = scmp.ne.s32.totalorder %s2001_s22, 0 }
 0x2d2   : > { %p2044_p7 = scmp.ge.s32.totalorder %s1115_s12, 2  ;;  %s753_s25 = scalar_lea.sflag [#allocation4], %s752_s27 }
 0x2d4   : > { %p876_p9 = pnand %p2044_p7, %p2043_p5 }
 0x2d6   : > { %1098 = dma.done.wait (!%p876_p9), %s753_s25, 128  }
 0x2d7   : > { %1100 = vsyncadd (!%p876_p9), %s753_s25, 4294967168  ;;  %p18_p11 = scmp.ge.s32.totalorder %s1164_s15, 4   ;;  %s2045_s9 = smov %s1107_s10 }
 0x2d8   : > { %s2046_s10 = smov %s1111_s11  ;;  %s2047_s11 = smov %s1176_s18 }
 0x2d9   : > { %s2048_s12 = smov %s1164_s15  ;;  %20 = sbr.rel (!%p18_p11) target bundleno = 7 (0x7), region = 86 }
 0x2e0   :  { %758 = vsyncpa [#allocation3], 1 }
 0x2e1   :  { %760 = vsyncpa [#allocation3 + $0x1], 1 }
 0x2e2   :  { %761 = vsyncpa [#allocation6], 1 }
 0x2e3   :  { %763 = vsyncpa [#allocation6 + $0x1], 1 }
 0x2e4   :  { %764 = vsyncpa [#allocation4], 1 }
 0x2e5   :  { %766 = vsyncpa [#allocation4 + $0x1], 1 }

</bundles_post_ra>
